<compile_context>
chip_gen: v7x
topology: tpu7x:2x2x1
jax: 0.10.0
libtpu: 0.0.40
codegen_flags: <defaults>
</compile_context>

<pallas_src>
import jax
import jax.numpy as jnp
from jax.experimental import pallas as pl
from jax.experimental.pallas import tpu as pltpu


def _round_up(a: int, b: int) -> int:
    return (a + b - 1) // b * b


def rev_block_kernel(x1_ref, x2_ref, wf_ref, bf_ref, wg_ref, bg_ref,
                     y1_ref, y2_ref):
    """One (TM, Hp) row tile of the reversible block.

    x1_ref, x2_ref : (TM, Hp) input halves (lane-dense)
    wf_ref, wg_ref : (Hp, Hp) resident weights
    bf_ref, bg_ref : (1, Hp)  resident biases
    y1_ref, y2_ref : (TM, Hp) output halves (lane-dense)
    """
    x1 = x1_ref[...]
    x2 = x2_ref[...]

    # y1 = x1 + f(x2); f32 accumulation, bias + residual add in f32.
    f_out = jnp.dot(x2, wf_ref[...], preferred_element_type=jnp.float32)
    y1_f32 = x1.astype(jnp.float32) + f_out + bf_ref[...].astype(jnp.float32)
    y1_ref[...] = y1_f32.astype(y1_ref.dtype)

    # y2 = x2 + g(y1); feed the MXU in the input dtype (bf16 stays bf16 for
    # 2x MXU throughput on v6e/v7x), accumulate/add in f32, cast at the store.
    g_in = y1_f32.astype(x1_ref.dtype)
    g_out = jnp.dot(g_in, wg_ref[...], preferred_element_type=jnp.float32)
    y2_f32 = x2.astype(jnp.float32) + g_out + bg_ref[...].astype(jnp.float32)
    y2_ref[...] = y2_f32.astype(y2_ref.dtype)


def reversible_block_forward(x, wf, bf, wg, bg, *, tm=256):
    """x: (batch, seq, D) with D even. Returns (batch, seq, D).

    f(z) = z @ wf + bf, g(z) = z @ wg + bg, applied as in ReversibleBlock.
    """
    B, S, D = x.shape
    H = D // 2
    assert 2 * H == D, "last dim must be even (chunk into 2)"
    assert wf.shape == (H, H) and wg.shape == (H, H)

    N = B * S
    # Sublane packing minimum: 8 rows for f32, 16 for bf16.
    sub = 16 if x.dtype == jnp.bfloat16 else 8
    tm_eff = max(sub, min(int(tm), _round_up(N, sub)))
    tm_eff = _round_up(tm_eff, sub)

    N_pad = _round_up(N, tm_eff)
    Hp = _round_up(H, 128)  # lane-dense blocks: multiple of the 128-lane vreg

    x2d = x.reshape(N, D)
    x1p = jnp.pad(x2d[:, :H], ((0, N_pad - N), (0, Hp - H)))
    x2p = jnp.pad(x2d[:, H:], ((0, N_pad - N), (0, Hp - H)))
    # Zero-padded weight rows/cols and bias lanes keep the padded region
    # exactly zero, so the [:N, :H] slice of the result is unchanged.
    wfp = jnp.pad(wf, ((0, Hp - H), (0, Hp - H)))
    wgp = jnp.pad(wg, ((0, Hp - H), (0, Hp - H)))
    bfp = jnp.pad(bf.reshape(1, H), ((0, 0), (0, Hp - H)))
    bgp = jnp.pad(bg.reshape(1, H), ((0, 0), (0, Hp - H)))

    grid = (N_pad // tm_eff,)

    # Explicit VMEM budget: double-buffered x1/x2/y1/y2 tiles + resident
    # weights/biases, capped at ~75% of physical VMEM (48 MiB v7x, 96 MiB v6e).
    io_itemsize = x.dtype.itemsize
    w_itemsize = wf.dtype.itemsize
    tile_bytes = 4 * 2 * tm_eff * Hp * io_itemsize          # 4 tiles, 2 buffers
    weight_bytes = 2 * (2 * Hp * Hp + 2 * 8 * Hp) * w_itemsize
    try:
        phys_vmem = int(getattr(pltpu.get_tpu_info(),
                                "vmem_capacity_bytes", 64 * 1024 * 1024))
    except Exception:
        phys_vmem = 64 * 1024 * 1024
    vmem_limit = int(min(max(tile_bytes + weight_bytes + (4 << 20), 16 << 20),
                         phys_vmem * 3 // 4))

    flops = 2 * (2 * N_pad * Hp * Hp)                        # two matmuls
    bytes_accessed = (4 * N_pad * Hp * io_itemsize           # x1, x2, y1, y2
                      + 2 * Hp * Hp * w_itemsize + 2 * Hp * w_itemsize)

    out_shape = (jax.ShapeDtypeStruct((N_pad, Hp), x.dtype),
                 jax.ShapeDtypeStruct((N_pad, Hp), x.dtype))
    io_spec = pl.BlockSpec((tm_eff, Hp), lambda i: (i, 0))

    def make_const_spec(shape, single_buffer):
        # Constant-index (resident) blocks: single-buffer them when supported
        # so the saved VMEM goes to the row tile instead.
        if single_buffer and hasattr(pl, "Buffered"):
            return pl.BlockSpec(shape, lambda i: (0, 0),
                                pipeline_mode=pl.Buffered(1))
        return pl.BlockSpec(shape, lambda i: (0, 0))

    def invoke(single_buffer_weights):
        w_spec = make_const_spec((Hp, Hp), single_buffer_weights)
        b_spec = make_const_spec((1, Hp), single_buffer_weights)
        return pl.pallas_call(
            rev_block_kernel,
            out_shape=out_shape,
            grid_spec=pltpu.PrefetchScalarGridSpec(
                num_scalar_prefetch=0,
                grid=grid,
                in_specs=[io_spec, io_spec, w_spec, b_spec, w_spec, b_spec],
                out_specs=[io_spec, io_spec],
            ),
            compiler_params=pltpu.CompilerParams(
                dimension_semantics=("parallel",),
                vmem_limit_bytes=vmem_limit,
            ),
            cost_estimate=pl.CostEstimate(
                flops=flops, transcendentals=0, bytes_accessed=bytes_accessed),
        )(x1p, x2p, wfp, bfp, wgp, bgp)

    # TODO(synk): for very large H (2*H*H*itemsize exceeding the VMEM budget,
    # e.g. H >= ~2048 f32 on v7x) add a K-tiled "arbitrary" grid axis with an
    # f32 VMEM accumulator instead of holding both weights fully resident.
    try:
        y1p, y2p = invoke(single_buffer_weights=True)
    except Exception:
        # Fallback if this Pallas build rejects pipeline_mode=Buffered(1).
        y1p, y2p = invoke(single_buffer_weights=False)

    out = jnp.concatenate([y1p[:N, :H], y2p[:N, :H]], axis=-1)
    return out.reshape(B, S, D)


def reversible_block_ref(x, wf, bf, wg, bg):
    """Pure-JAX reference mirroring the PyTorch forward."""
    H = x.shape[-1] // 2
    x1, x2 = x[..., :H], x[..., H:]
    y1 = x1 + (x2 @ wf + bf)
    y2 = x2 + (y1 @ wg + bg)
    return jnp.concatenate([y1, y2], axis=-1)


if __name__ == "__main__":
    def make_inputs(key, B, S, D, dtype=jnp.float32):
        H = D // 2
        kx, kwf, kbf, kwg, kbg = jax.random.split(key, 5)
        x = jax.random.normal(kx, (B, S, D), dtype=dtype)
        wf = jax.random.normal(kwf, (H, H), dtype=dtype) / (H ** 0.5)
        bf = jax.random.normal(kbf, (H,), dtype=dtype) * 0.1
        wg = jax.random.normal(kwg, (H, H), dtype=dtype) / (H ** 0.5)
        bg = jax.random.normal(kbg, (H,), dtype=dtype) * 0.1
        return x, wf, bf, wg, bg

    # Small shape consistent with the module: batch=2, seq=8, hidden=32 (H=16).
    x, wf, bf, wg, bg = make_inputs(jax.random.PRNGKey(0), 2, 8, 32)
    out = jax.block_until_ready(reversible_block_forward(x, wf, bf, wg, bg))
    ref = reversible_block_ref(x, wf, bf, wg, bg)
    assert out.shape == x.shape
    assert jnp.allclose(out, ref, atol=1e-4, rtol=1e-4), "mismatch (small shape)"

    # Second check exercising the tiled + padded path
    # (N=400 -> N_pad=512, two 256-row tiles; H=96 -> padded to 128 lanes).
    x, wf, bf, wg, bg = make_inputs(jax.random.PRNGKey(1), 2, 200, 192)
    out = jax.block_until_ready(reversible_block_forward(x, wf, bf, wg, bg))
    ref = reversible_block_ref(x, wf, bf, wg, bg)
    assert out.shape == x.shape
    assert jnp.allclose(out, ref, atol=2e-4, rtol=1e-4), "mismatch (tiled shape)"

    # TODO(synk): backward_apply (activation-recomputing backward) is training-
    # time autograd machinery; only the forward is implemented here.
    print("KERNEL_OK")
</pallas_src>

<mosaic_0001>
module attributes {stable_mosaic.version = 11 : i64} {
  func.func @rev_block_kernel(%arg0: i32, %arg1: memref<16x128xf32, #tpu.memory_space<vmem>>, %arg2: memref<16x128xf32, #tpu.memory_space<vmem>>, %arg3: memref<128x128xf32, #tpu.memory_space<vmem>>, %arg4: memref<1x128xf32, #tpu.memory_space<vmem>>, %arg5: memref<128x128xf32, #tpu.memory_space<vmem>>, %arg6: memref<1x128xf32, #tpu.memory_space<vmem>>, %arg7: memref<16x128xf32, #tpu.memory_space<vmem>>, %arg8: memref<16x128xf32, #tpu.memory_space<vmem>>) attributes {dimension_semantics = [#tpu.dimension_semantics<parallel>], iteration_bounds = array<i64: 1>, scalar_prefetch = 0 : i64, scratch_operands = 0 : i64, tpu.core_type = #tpu.core_type<tc>, window_params = [{transform_indices = @transform_0, window_bounds = array<i64: 16, 128>}, {transform_indices = @transform_1, window_bounds = array<i64: 16, 128>}, {pipeline_mode = #tpu.pipeline_mode<synchronous>, transform_indices = @transform_2, window_bounds = array<i64: 128, 128>}, {pipeline_mode = #tpu.pipeline_mode<synchronous>, transform_indices = @transform_3, window_bounds = array<i64: 1, 128>}, {pipeline_mode = #tpu.pipeline_mode<synchronous>, transform_indices = @transform_4, window_bounds = array<i64: 128, 128>}, {pipeline_mode = #tpu.pipeline_mode<synchronous>, transform_indices = @transform_5, window_bounds = array<i64: 1, 128>}, {transform_indices = @transform_6, window_bounds = array<i64: 16, 128>}, {transform_indices = @transform_7, window_bounds = array<i64: 16, 128>}]} {
    %c0 = arith.constant 0 : index
    %c0_0 = arith.constant 0 : index
    %0 = vector.load %arg1[%c0, %c0_0] : memref<16x128xf32, #tpu.memory_space<vmem>>, vector<16x128xf32>
    %c0_1 = arith.constant 0 : index
    %c0_2 = arith.constant 0 : index
    %1 = vector.load %arg2[%c0_1, %c0_2] : memref<16x128xf32, #tpu.memory_space<vmem>>, vector<16x128xf32>
    %c0_3 = arith.constant 0 : index
    %c0_4 = arith.constant 0 : index
    %2 = vector.load %arg3[%c0_3, %c0_4] : memref<128x128xf32, #tpu.memory_space<vmem>>, vector<128x128xf32>
    %cst = arith.constant dense<0.000000e+00> : vector<16x128xf32>
    %3 = tpu.matmul %1, %2, %cst {dimension_numbers = #tpu.dot_dimension_numbers<[1], [0], [0], [1], [0, 0, 1, 1], [], []>} : vector<16x128xf32>, vector<128x128xf32>, vector<16x128xf32> -> vector<16x128xf32>
    %4 = arith.addf %0, %3 : vector<16x128xf32>
    %c0_5 = arith.constant 0 : index
    %c0_6 = arith.constant 0 : index
    %5 = vector.load %arg4[%c0_5, %c0_6] : memref<1x128xf32, #tpu.memory_space<vmem>>, vector<1x128xf32>
    %6 = vector.broadcast %5 : vector<1x128xf32> to vector<16x128xf32>
    %7 = arith.addf %4, %6 : vector<16x128xf32>
    %c0_7 = arith.constant 0 : index
    %c0_8 = arith.constant 0 : index
    %8 = vector.load %arg7[%c0_7, %c0_8] : memref<16x128xf32, #tpu.memory_space<vmem>>, vector<16x128xf32>
    tpu.vector_store %arg7[%c0_7, %c0_8], %7 {strides = array<i32>} : memref<16x128xf32, #tpu.memory_space<vmem>>, vector<16x128xf32>,
    %c0_9 = arith.constant 0 : index
    %c0_10 = arith.constant 0 : index
    %9 = vector.load %arg5[%c0_9, %c0_10] : memref<128x128xf32, #tpu.memory_space<vmem>>, vector<128x128xf32>
    %cst_11 = arith.constant dense<0.000000e+00> : vector<16x128xf32>
    %10 = tpu.matmul %7, %9, %cst_11 {dimension_numbers = #tpu.dot_dimension_numbers<[1], [0], [0], [1], [0, 0, 1, 1], [], []>} : vector<16x128xf32>, vector<128x128xf32>, vector<16x128xf32> -> vector<16x128xf32>
    %11 = arith.addf %1, %10 : vector<16x128xf32>
    %c0_12 = arith.constant 0 : index
    %c0_13 = arith.constant 0 : index
    %12 = vector.load %arg6[%c0_12, %c0_13] : memref<1x128xf32, #tpu.memory_space<vmem>>, vector<1x128xf32>
    %13 = vector.broadcast %12 : vector<1x128xf32> to vector<16x128xf32>
    %14 = arith.addf %11, %13 : vector<16x128xf32>
    %c0_14 = arith.constant 0 : index
    %c0_15 = arith.constant 0 : index
    %15 = vector.load %arg8[%c0_14, %c0_15] : memref<16x128xf32, #tpu.memory_space<vmem>>, vector<16x128xf32>
    tpu.vector_store %arg8[%c0_14, %c0_15], %14 {strides = array<i32>} : memref<16x128xf32, #tpu.memory_space<vmem>>, vector<16x128xf32>,
    return
  }
  func.func @transform_0(%arg0: i32) -> (i32, i32) {
    %c0_i32 = arith.constant 0 : i32
    %c0_i32_0 = arith.constant 0 : i32
    return %arg0, %c0_i32 : i32, i32
  }
  func.func @transform_1(%arg0: i32) -> (i32, i32) {
    %c0_i32 = arith.constant 0 : i32
    %c0_i32_0 = arith.constant 0 : i32
    return %arg0, %c0_i32 : i32, i32
  }
  func.func @transform_2(%arg0: i32) -> (i32, i32) {
    %c0_i32 = arith.constant 0 : i32
    %c0_i32_0 = arith.constant 0 : i32
    %c0_i32_1 = arith.constant 0 : i32
    return %c0_i32, %c0_i32_0 : i32, i32
  }
  func.func @transform_3(%arg0: i32) -> (i32, i32) {
    %c0_i32 = arith.constant 0 : i32
    %c0_i32_0 = arith.constant 0 : i32
    %c0_i32_1 = arith.constant 0 : i32
    return %c0_i32, %c0_i32_0 : i32, i32
  }
  func.func @transform_4(%arg0: i32) -> (i32, i32) {
    %c0_i32 = arith.constant 0 : i32
    %c0_i32_0 = arith.constant 0 : i32
    %c0_i32_1 = arith.constant 0 : i32
    return %c0_i32, %c0_i32_0 : i32, i32
  }
  func.func @transform_5(%arg0: i32) -> (i32, i32) {
    %c0_i32 = arith.constant 0 : i32
    %c0_i32_0 = arith.constant 0 : i32
    %c0_i32_1 = arith.constant 0 : i32
    return %c0_i32, %c0_i32_0 : i32, i32
  }
  func.func @transform_6(%arg0: i32) -> (i32, i32) {
    %c0_i32 = arith.constant 0 : i32
    %c0_i32_0 = arith.constant 0 : i32
    return %arg0, %c0_i32 : i32, i32
  }
  func.func @transform_7(%arg0: i32) -> (i32, i32) {
    %c0_i32 = arith.constant 0 : i32
    %c0_i32_0 = arith.constant 0 : i32
    return %arg0, %c0_i32 : i32, i32
  }
}

module attributes {stable_mosaic.version = 11 : i64} {
  func.func @rev_block_kernel(%arg0: i32, %arg1: memref<16x128xf32, #tpu.memory_space<vmem>>, %arg2: memref<16x128xf32, #tpu.memory_space<vmem>>, %arg3: memref<128x128xf32, #tpu.memory_space<vmem>>, %arg4: memref<1x128xf32, #tpu.memory_space<vmem>>, %arg5: memref<128x128xf32, #tpu.memory_space<vmem>>, %arg6: memref<1x128xf32, #tpu.memory_space<vmem>>, %arg7: memref<16x128xf32, #tpu.memory_space<vmem>>, %arg8: memref<16x128xf32, #tpu.memory_space<vmem>>) attributes {dimension_semantics = [#tpu.dimension_semantics<parallel>], iteration_bounds = array<i64: 1>, scalar_prefetch = 0 : i64, scratch_operands = 0 : i64, tpu.core_type = #tpu.core_type<tc>, window_params = [{transform_indices = @transform_0, window_bounds = array<i64: 16, 128>}, {transform_indices = @transform_1, window_bounds = array<i64: 16, 128>}, {pipeline_mode = #tpu.pipeline_mode<synchronous>, transform_indices = @transform_2, window_bounds = array<i64: 128, 128>}, {pipeline_mode = #tpu.pipeline_mode<synchronous>, transform_indices = @transform_3, window_bounds = array<i64: 1, 128>}, {pipeline_mode = #tpu.pipeline_mode<synchronous>, transform_indices = @transform_4, window_bounds = array<i64: 128, 128>}, {pipeline_mode = #tpu.pipeline_mode<synchronous>, transform_indices = @transform_5, window_bounds = array<i64: 1, 128>}, {transform_indices = @transform_6, window_bounds = array<i64: 16, 128>}, {transform_indices = @transform_7, window_bounds = array<i64: 16, 128>}]} {
    %c0 = arith.constant 0 : index
    %c0_0 = arith.constant 0 : index
    %0 = vector.load %arg1[%c0, %c0_0] : memref<16x128xf32, #tpu.memory_space<vmem>>, vector<16x128xf32>
    %c0_1 = arith.constant 0 : index
    %c0_2 = arith.constant 0 : index
    %1 = vector.load %arg2[%c0_1, %c0_2] : memref<16x128xf32, #tpu.memory_space<vmem>>, vector<16x128xf32>
    %c0_3 = arith.constant 0 : index
    %c0_4 = arith.constant 0 : index
    %2 = vector.load %arg3[%c0_3, %c0_4] : memref<128x128xf32, #tpu.memory_space<vmem>>, vector<128x128xf32>
    %cst = arith.constant dense<0.000000e+00> : vector<16x128xf32>
    %3 = tpu.matmul %1, %2, %cst {dimension_numbers = #tpu.dot_dimension_numbers<[1], [0], [0], [1], [0, 0, 1, 1], [], []>} : vector<16x128xf32>, vector<128x128xf32>, vector<16x128xf32> -> vector<16x128xf32>
    %4 = arith.addf %0, %3 : vector<16x128xf32>
    %c0_5 = arith.constant 0 : index
    %c0_6 = arith.constant 0 : index
    %5 = vector.load %arg4[%c0_5, %c0_6] : memref<1x128xf32, #tpu.memory_space<vmem>>, vector<1x128xf32>
    %6 = vector.broadcast %5 : vector<1x128xf32> to vector<16x128xf32>
    %7 = arith.addf %4, %6 : vector<16x128xf32>
    %c0_7 = arith.constant 0 : index
    %c0_8 = arith.constant 0 : index
    %8 = vector.load %arg7[%c0_7, %c0_8] : memref<16x128xf32, #tpu.memory_space<vmem>>, vector<16x128xf32>
    tpu.vector_store %arg7[%c0_7, %c0_8], %7 {strides = array<i32>} : memref<16x128xf32, #tpu.memory_space<vmem>>, vector<16x128xf32>,
    %c0_9 = arith.constant 0 : index
    %c0_10 = arith.constant 0 : index
    %9 = vector.load %arg5[%c0_9, %c0_10] : memref<128x128xf32, #tpu.memory_space<vmem>>, vector<128x128xf32>
    %cst_11 = arith.constant dense<0.000000e+00> : vector<16x128xf32>
    %10 = tpu.matmul %7, %9, %cst_11 {dimension_numbers = #tpu.dot_dimension_numbers<[1], [0], [0], [1], [0, 0, 1, 1], [], []>} : vector<16x128xf32>, vector<128x128xf32>, vector<16x128xf32> -> vector<16x128xf32>
    %11 = arith.addf %1, %10 : vector<16x128xf32>
    %c0_12 = arith.constant 0 : index
    %c0_13 = arith.constant 0 : index
    %12 = vector.load %arg6[%c0_12, %c0_13] : memref<1x128xf32, #tpu.memory_space<vmem>>, vector<1x128xf32>
    %13 = vector.broadcast %12 : vector<1x128xf32> to vector<16x128xf32>
    %14 = arith.addf %11, %13 : vector<16x128xf32>
    %c0_14 = arith.constant 0 : index
    %c0_15 = arith.constant 0 : index
    %15 = vector.load %arg8[%c0_14, %c0_15] : memref<16x128xf32, #tpu.memory_space<vmem>>, vector<16x128xf32>
    tpu.vector_store %arg8[%c0_14, %c0_15], %14 {strides = array<i32>} : memref<16x128xf32, #tpu.memory_space<vmem>>, vector<16x128xf32>,
    return
  }
  func.func @transform_0(%arg0: i32) -> (i32, i32) {
    %c0_i32 = arith.constant 0 : i32
    %c0_i32_0 = arith.constant 0 : i32
    return %arg0, %c0_i32 : i32, i32
  }
  func.func @transform_1(%arg0: i32) -> (i32, i32) {
    %c0_i32 = arith.constant 0 : i32
    %c0_i32_0 = arith.constant 0 : i32
    return %arg0, %c0_i32 : i32, i32
  }
  func.func @transform_2(%arg0: i32) -> (i32, i32) {
    %c0_i32 = arith.constant 0 : i32
    %c0_i32_0 = arith.constant 0 : i32
    %c0_i32_1 = arith.constant 0 : i32
    return %c0_i32, %c0_i32_0 : i32, i32
  }
  func.func @transform_3(%arg0: i32) -> (i32, i32) {
    %c0_i32 = arith.constant 0 : i32
    %c0_i32_0 = arith.constant 0 : i32
    %c0_i32_1 = arith.constant 0 : i32
    return %c0_i32, %c0_i32_0 : i32, i32
  }
  func.func @transform_4(%arg0: i32) -> (i32, i32) {
    %c0_i32 = arith.constant 0 : i32
    %c0_i32_0 = arith.constant 0 : i32
    %c0_i32_1 = arith.constant 0 : i32
    return %c0_i32, %c0_i32_0 : i32, i32
  }
  func.func @transform_5(%arg0: i32) -> (i32, i32) {
    %c0_i32 = arith.constant 0 : i32
    %c0_i32_0 = arith.constant 0 : i32
    %c0_i32_1 = arith.constant 0 : i32
    return %c0_i32, %c0_i32_0 : i32, i32
  }
  func.func @transform_6(%arg0: i32) -> (i32, i32) {
    %c0_i32 = arith.constant 0 : i32
    %c0_i32_0 = arith.constant 0 : i32
    return %arg0, %c0_i32 : i32, i32
  }
  func.func @transform_7(%arg0: i32) -> (i32, i32) {
    %c0_i32 = arith.constant 0 : i32
    %c0_i32_0 = arith.constant 0 : i32
    return %arg0, %c0_i32 : i32, i32
  }
}

</mosaic_0001>

<bundles_post_ra>
// kernel: tpu_custom_call.1
= control target key start
LH: loop header
LB: loop body
LE: loop exit
PB: predicated region body
PF: predicated region fallthrough
CT: control target
= control target key end

     0   :  { %13 = vsyncpa [#allocation3], 0  ;;  %s813_s0 = inlined_call_operand.hbm [shape: f32[16,128], index: 0, kind: input, shape index: {}]   ;;  %s814_s1 = inlined_call_operand.hbm [shape: f32[16,128], index: 1, kind: input, shape index: {}]   ;;  %s815_s2 = inlined_call_operand.hbm [shape: f32[128,128], index: 2, kind: input, shape index: {}]   ;;  %s816_s3 = inlined_call_operand.vmem [shape: f32[1,128], index: 3, kind: input, shape index: {}]   ;;  %s817_s4 = inlined_call_operand.hbm [shape: f32[128,128], index: 4, kind: input, shape index: {}]   ;;  %s818_s5 = inlined_call_operand.vmem [shape: f32[1,128], index: 5, kind: input, shape index: {}]   ;;  %s819_s6 = inlined_call_operand.hbm [shape: f32[16,128], index: 6, kind: output, shape index: {0}]   ;;  %s820_s7 = inlined_call_operand.hbm [shape: f32[16,128], index: 7, kind: output, shape index: {1}]  }
   0x1   :  { %14 = vsyncpa [#allocation6], 0 }
   0x2   :  { %15 = vsyncpa [#allocation9], 0 }
   0x3   :  { %16 = vsyncpa [#allocation4], 0 }
   0x4   :  { %17 = vsyncpa [#allocation12], 0  ;;  %s651_s24 = smov [#allocation5]   ;;  %s652_s26 = smov [#allocation2]  }
   0x5   :  { %s35_s25 = sshll.u32 %s651_s24, 4  ;;  %s23_s27 = sshll.u32 %s652_s26, 4  ;;  %s36_s25 = int_to_ptr.vmem [resolvable:$true] %s35_s25  ;;  %s699_s27 = int_to_ptr.vmem [resolvable:$true] %s23_s27 }
   0x6   :  { %s509_s30 = scalar_lea.hbm %s814_s1, 256 }
   0x7   :  { %p510_p0 = scmp.ne.s32.totalorder %s814_s1, %s509_s30  ;;  %p513_p1 = scmp.lt.u32.totalorder %s509_s30, %s814_s1 }
   0x9   :  { %p515_p2 = pnand %p513_p1, %p510_p0 }
   0xb   :  { %518 = shalt.err (!%p515_p2)
}
   0xc   :  { %s519_s12 = scalar_lea.vmem %s36_s25, 256  ;;  %p524_p4 = scmp.lt.s32.totalorder %s36_s25, %s36_s25 }
   0xd   :  { %p520_p3 = scmp.ne.s32.totalorder %s36_s25, %s519_s12  ;;  %p525_p5 = scmp.lt.s32.totalorder %s519_s12, %s519_s12 }
   0xf   :  { %p526_p6 = por %p525_p5, %p524_p4 }
  0x11   :  { %p527_p7 = pnand %p526_p6, %p520_p3 }
  0x13   :  { %530 = shalt.err (!%p527_p7)
}
  0x14   :  { %s653_s13 = smov 128   ;;  %s654_s14 = smov 8  }
  0x15   :  { %41 = dma.hbm_to_vmem [thread:$0]  %s814_s1, 256, %s36_s25, [#allocation6], %s653_s13, %s653_s13, %s654_s14  }
  0x16   :  { %s531_s19 = scalar_lea.hbm %s813_s0, 256 }
  0x17   :  { %p532_p8 = scmp.ne.s32.totalorder %s813_s0, %s531_s19  ;;  %p535_p9 = scmp.lt.u32.totalorder %s531_s19, %s813_s0 }
  0x19   :  { %p537_p10 = pnand %p535_p9, %p532_p8 }
  0x1b   :  { %540 = shalt.err (!%p537_p10)
}
  0x1c   :  { %s541_s24 = scalar_lea.vmem %s699_s27, 256  ;;  %p546_p12 = scmp.lt.s32.totalorder %s699_s27, %s699_s27 }
  0x1d   :  { %p542_p11 = scmp.ne.s32.totalorder %s699_s27, %s541_s24  ;;  %p547_p13 = scmp.lt.s32.totalorder %s541_s24, %s541_s24 }
  0x1f   :  { %p548_p0 = por %p547_p13, %p546_p12 }
  0x21   :  { %p549_p1 = pnand %p548_p0, %p542_p11 }
  0x23   :  { %552 = shalt.err (!%p549_p1)
}
  0x24   :  { %29 = dma.hbm_to_vmem [thread:$0]  %s813_s0, 256, %s699_s27, [#allocation3], %s653_s13, %s653_s13, %s654_s14  }
  0x25   :  { %s655_s26 = smov [#allocation7]   ;;  %s656_s29 = smov [#allocation8]  }
  0x26   :  { %s47_s28 = sshll.u32 %s655_s26, 4  ;;  %s61_s30 = sshll.u32 %s656_s29, 4  ;;  %s48_s28 = int_to_ptr.vmem [resolvable:$true] %s47_s28  ;;  %s736_s30 = int_to_ptr.vmem [resolvable:$true] %s61_s30 }
  0x27   :  { %s553_s10 = scalar_lea.hbm %s815_s2, 2048 }
  0x28   :  { %p554_p2 = scmp.ne.s32.totalorder %s815_s2, %s553_s10  ;;  %p557_p3 = scmp.lt.u32.totalorder %s553_s10, %s815_s2 }
  0x2a   :  { %p559_p4 = pnand %p557_p3, %p554_p2 }
  0x2c   :  { %562 = shalt.err (!%p559_p4)
}
  0x2d   :  { %s563_s0 = scalar_lea.vmem %s48_s28, 2048  ;;  %p568_p6 = scmp.lt.s32.totalorder %s48_s28, %s48_s28 }
  0x2e   :  { %p564_p5 = scmp.ne.s32.totalorder %s48_s28, %s563_s0  ;;  %p569_p7 = scmp.lt.s32.totalorder %s563_s0, %s563_s0 }
  0x30   :  { %p570_p8 = por %p569_p7, %p568_p6 }
  0x32   :  { %p571_p9 = pnand %p570_p8, %p564_p5 }
  0x34   :  { %574 = shalt.err (!%p571_p9)
}
  0x35   :  { %53 = dma.hbm_to_vmem [thread:$0]  %s815_s2, 2048, %s48_s28, [#allocation6], %s653_s13, %s653_s13, %s654_s14  }
  0x36   :  { %s575_s20 = scalar_lea.hbm %s817_s4, 2048 }
  0x37   :  { %p576_p10 = scmp.ne.s32.totalorder %s817_s4, %s575_s20  ;;  %p579_p11 = scmp.lt.u32.totalorder %s575_s20, %s817_s4 }
  0x39   :  { %p581_p12 = pnand %p579_p11, %p576_p10 }
  0x3b   :  { %584 = shalt.err (!%p581_p12)
}
  0x3c   :  { %s585_s1 = scalar_lea.vmem %s736_s30, 2048  ;;  %p590_p0 = scmp.lt.s32.totalorder %s736_s30, %s736_s30 }
  0x3d   :  { %p586_p13 = scmp.ne.s32.totalorder %s736_s30, %s585_s1  ;;  %p591_p1 = scmp.lt.s32.totalorder %s585_s1, %s585_s1 }
  0x3f   :  { %p592_p2 = por %p591_p1, %p590_p0 }
  0x41   :  { %p593_p3 = pnand %p592_p2, %p586_p13 }
  0x43   :  { %596 = shalt.err (!%p593_p3)
}
  0x44   :  { %67 = dma.hbm_to_vmem [thread:$0]  %s817_s4, 2048, %s736_s30, [#allocation9], %s653_s13, %s653_s13, %s654_s14  }
  0x45   :  { %641 = dma.done.wait [#allocation3], 256  }
  0x46   :  { %642 = vsyncadd [#allocation3], 4294967040 }
  0x47   :  { %643 = dma.done.wait [#allocation6], 2304  }
  0x48   :  { %644 = vsyncadd [#allocation6], 4294964992 }
  0x49   :  { %645 = dma.done.wait [#allocation9], 2048  }
  0x4a   :  { %646 = vsyncadd [#allocation9], 4294965248  ;;  %v86_v0 = vld [vmem:[#allocation7] sm:$0xff]  ;;  %v87_v1 = vld [vmem:[#allocation7 + $0x8] sm:$0xff]  ;;  %s657_s28 = smov [#allocation10]  }
  0x4b   :  { %v88_v2 = vld [vmem:[#allocation7 + $0x10] sm:$0xff]  ;;  %v437_v3 = vpack.c.bf16 %v87_v1, %v86_v0  ;;  %v89_v4 = vld [vmem:[#allocation7 + $0x18] sm:$0xff]  ;;  %v90_v6 = vld [vmem:[#allocation7 + $0x20] sm:$0xff]  ;;  %s299_s29 = sshll.u32 %s657_s28, 4  ;;  %s300_s29 = int_to_ptr.vmem [resolvable:$true] %s299_s29 }
  0x4c   :  { %v441_v5 = vpack.c.bf16 %v89_v4, %v88_v2  ;;  %v91_v7 = vld [vmem:[#allocation7 + $0x28] sm:$0xff]  ;;  %v92_v9 = vld [vmem:[#allocation7 + $0x30] sm:$0xff]  ;;  %v93_v10 = vld [vmem:[#allocation7 + $0x38] sm:$0xff]  ;;  %s597_s30 = scalar_lea.vmem %s300_s29, 256  ;;  %p602_p5 = scmp.lt.s32.totalorder %s300_s29, %s300_s29 }
  0x4d   :  { %438 = vmatprep.subr.bf16.mxu0 %v437_v3  ;;  %v445_v8 = vpack.c.bf16 %v91_v7, %v90_v6  ;;  %v773_v11 = vld [vmem:[#allocation5] sm:$0xff]  ;;  %v190_v12 = vld [vmem:[#allocation8] sm:$0xff]  ;;  %v191_v13 = vld [vmem:[#allocation8 + $0x8] sm:$0xff]  ;;  %v449_v20 = vpack.c.bf16 %v93_v10, %v92_v9  ;;  %p598_p4 = scmp.ne.s32.totalorder %s300_s29, %s597_s30  ;;  %p603_p6 = scmp.lt.s32.totalorder %s597_s30, %s597_s30 }
  0x4e   :  { %440 = vmatpush3.bf16.msra.mxu0 %v437_v3  ;;  %399 = vmatprep.mubr.f32.mxu0 %v773_v11  ;;  %v192_v14 = vld [vmem:[#allocation8 + $0x10] sm:$0xff]  ;;  %v469_v15 = vpack.c.bf16 %v191_v13, %v190_v12  ;;  %v193_v16 = vld [vmem:[#allocation8 + $0x18] sm:$0xff]  ;;  %v194_v18 = vld [vmem:[#allocation8 + $0x20] sm:$0xff] }
  0x4f   :  { %442 = vmatprep.subr.bf16.mxu0 %v441_v5  ;;  %v473_v17 = vpack.c.bf16 %v193_v16, %v192_v14  ;;  %v195_v19 = vld [vmem:[#allocation8 + $0x28] sm:$0xff]  ;;  %v94_v21 = vld [vmem:[#allocation7 + $0x40] sm:$0xff]  ;;  %v196_v24 = vld [vmem:[#allocation8 + $0x30] sm:$0xff]  ;;  %p604_p7 = por %p603_p6, %p602_p5 }
  0x50   :  { %470 = vmatprep.subr.bf16.mxu1 %v469_v15  ;;  %v95_v22 = vld [vmem:[#allocation7 + $0x48] sm:$0xff]  ;;  %v477_v23 = vpack.c.bf16 %v195_v19, %v194_v18  ;;  %v197_v25 = vld [vmem:[#allocation8 + $0x38] sm:$0xff]  ;;  %v96_v27 = vld [vmem:[#allocation7 + $0x50] sm:$0xff] }
  0x51   :  { %472 = vmatpush3.bf16.msra.mxu1 %v469_v15  ;;  %v453_v26 = vpack.c.bf16 %v95_v22, %v94_v21  ;;  %v97_v28 = vld [vmem:[#allocation7 + $0x58] sm:$0xff]  ;;  %v481_v29 = vpack.c.bf16 %v197_v25, %v196_v24  ;;  %v198_v30 = vld [vmem:[#allocation8 + $0x40] sm:$0xff]  ;;  %v199_v31 = vld [vmem:[#allocation8 + $0x48] sm:$0xff]  ;;  %p605_p8 = pnand %p604_p7, %p598_p4 }
  0x52   :  { %444 = vmatpush3.bf16.msra.mxu0 %v441_v5  ;;  %474 = vmatprep.subr.bf16.mxu1 %v473_v17  ;;  %v457_v32 = vpack.c.bf16 %v97_v28, %v96_v27  ;;  %v98_v33 = vld [vmem:[#allocation7 + $0x60] sm:$0xff]  ;;  %v99_v34 = vld [vmem:[#allocation7 + $0x68] sm:$0xff]  ;;  %v485_v35 = vpack.c.bf16 %v199_v31, %v198_v30  ;;  %v200_v36 = vld [vmem:[#allocation8 + $0x50] sm:$0xff] }
  0x53   :  { %446 = vmatprep.subr.bf16.mxu0 %v445_v8  ;;  %v201_v37 = vld [vmem:[#allocation8 + $0x58] sm:$0xff]  ;;  %v461_v38 = vpack.c.bf16 %v99_v34, %v98_v33  ;;  %v100_v39 = vld [vmem:[#allocation7 + $0x70] sm:$0xff]  ;;  %v202_v42 = vld [vmem:[#allocation8 + $0x60] sm:$0xff] }
  0x54   :  { %v101_v40 = vld [vmem:[#allocation7 + $0x78] sm:$0xff]  ;;  %v489_v41 = vpack.c.bf16 %v201_v37, %v200_v36  ;;  %v203_v43 = vld [vmem:[#allocation8 + $0x68] sm:$0xff]  ;;  %v204_v47 = vld [vmem:[#allocation8 + $0x70] sm:$0xff] }
  0x55   :  { %476 = vmatpush3.bf16.msra.mxu1 %v473_v17  ;;  %v465_v44 = vpack.c.bf16 %v101_v40, %v100_v39  ;;  %v493_v45 = vpack.c.bf16 %v203_v43, %v202_v42  ;;  %v85_v46 = vld [vmem:[#allocation5 + $0x8] sm:$0xff]  ;;  %v83_v50 = vld [vmem:[#allocation2 + $0x8] sm:$0xff]  ;;  %v82_v51 = vld [vmem:[#allocation2] sm:$0xff] }
  0x56   :  { %448 = vmatpush3.bf16.msra.mxu0 %v445_v8  ;;  %478 = vmatprep.subr.bf16.mxu1 %v477_v23  ;;  %v205_v48 = vld [vmem:[#allocation8 + $0x78] sm:$0xff]  ;;  %v329_v53 = vld [vmem:[%s816_s3] ss:$0 sm:$0xff] }
  0x57   :  { %450 = vmatprep.subr.bf16.mxu0 %v449_v20  ;;  %v497_v49 = vpack.c.bf16 %v205_v48, %v204_v47 }
  0x59   :  { %480 = vmatpush3.bf16.msra.mxu1 %v477_v23 }
  0x5a   :  { %452 = vmatpush3.bf16.msra.mxu0 %v449_v20  ;;  %482 = vmatprep.subr.bf16.mxu1 %v481_v29 }
  0x5b   :  { %454 = vmatprep.subr.bf16.mxu0 %v453_v26 }
  0x5d   :  { %484 = vmatpush3.bf16.msra.mxu1 %v481_v29 }
  0x5e   :  { %456 = vmatpush3.bf16.msra.mxu0 %v453_v26  ;;  %486 = vmatprep.subr.bf16.mxu1 %v485_v35 }
  0x5f   :  { %458 = vmatprep.subr.bf16.mxu0 %v457_v32 }
  0x61   :  { %488 = vmatpush3.bf16.msra.mxu1 %v485_v35 }
  0x62   :  { %460 = vmatpush3.bf16.msra.mxu0 %v457_v32  ;;  %490 = vmatprep.subr.bf16.mxu1 %v489_v41 }
  0x63   :  { %462 = vmatprep.subr.bf16.mxu0 %v461_v38 }
  0x65   :  { %492 = vmatpush3.bf16.msra.mxu1 %v489_v41 }
  0x66   :  { %464 = vmatpush3.bf16.msra.mxu0 %v461_v38  ;;  %494 = vmatprep.subr.bf16.mxu1 %v493_v45 }
  0x67   :  { %466 = vmatprep.subr.bf16.mxu0 %v465_v44 }
  0x69   :  { %496 = vmatpush3.bf16.msra.mxu1 %v493_v45 }
  0x6a   :  { %468 = vmatpush3.bf16.msra.mxu0 %v465_v44  ;;  %498 = vmatprep.subr.bf16.mxu1 %v497_v49 }
  0x6d   :  { %400 = vmatmul.mubr.f32.vlgmr.msra.gmra.mrb[0].mxu0 %v85_v46  ;;  %500 = vmatpush3.bf16.msra.mxu1 %v497_v49 }
 0x140   :  { %v401_v52 = vpop.f32.mrb[0].mxu0 }
 0x141   :  { %v178_v54 = vadd.f32 %v401_v52, %v83_v50  ;;  %v168_v55 = vpop.f32.mrb[1].mxu0 }
 0x142   :  { %v177_v56 = vadd.f32 %v168_v55, %v82_v51 }
 0x143   :  { %v187_v57 = vadd.f32 %v329_v53, %v178_v54 }
 0x144   :  { %v186_v58 = vadd.f32 %v329_v53, %v177_v56 }
 0x145   :  { %189 = vst [vmem:[#allocation10 + $0x8] sm:$0xff] %v187_v57 }
 0x146   :  { %434 = vmatprep.mubr.f32.mxu1 %v186_v58  ;;  %188 = vst [vmem:[#allocation10] sm:$0xff] %v186_v58 }
 0x147   :  { %435 = vmatmul.mubr.f32.vlgmr.msra.gmra.mrb[0].mxu1 %v187_v57 }
 0x148   :  { %608 = shalt.err (!%p605_p8)
}
 0x149   :  { %s609_s9 = scalar_lea.hbm %s819_s6, 256 }
 0x14a   :  { %p610_p9 = scmp.ne.s32.totalorder %s819_s6, %s609_s9  ;;  %p613_p10 = scmp.lt.u32.totalorder %s609_s9, %s819_s6 }
 0x14c   :  { %p615_p11 = pnand %p613_p10, %p610_p9 }
 0x14e   :  { %618 = shalt.err (!%p615_p11)
}
 0x14f   :  { %305 = dma.vmem_to_hbm [thread:$0]  %s300_s29, 256, %s819_s6, [#allocation4], %s653_s13, %s653_s13, %s654_s14  }
 0x150   :  { %v330_v60 = vld [vmem:[%s818_s5] ss:$0 sm:$0xff]  ;;  %s658_s18 = smov [#allocation11]  }
 0x151   :  { %s311_s19 = sshll.u32 %s658_s18, 4  ;;  %s312_s19 = int_to_ptr.vmem [resolvable:$true] %s311_s19 }
 0x152   :  { %s619_s20 = scalar_lea.vmem %s312_s19, 256  ;;  %p624_p13 = scmp.lt.s32.totalorder %s312_s19, %s312_s19 }
 0x153   :  { %p620_p12 = scmp.ne.s32.totalorder %s312_s19, %s619_s20  ;;  %p625_p0 = scmp.lt.s32.totalorder %s619_s20, %s619_s20 }
 0x155   :  { %p626_p1 = por %p625_p0, %p624_p13 }
 0x157   :  { %p627_p2 = pnand %p626_p1, %p620_p12 }
 0x21a   :  { %v436_v59 = vpop.f32.mrb[0].mxu1 }
 0x21b   :  { %v282_v61 = vadd.f32 %v436_v59, %v85_v46  ;;  %v272_v62 = vpop.f32.mrb[1].mxu1 }
 0x21c   :  { %v281_v63 = vadd.f32 %v272_v62, %v773_v11 }
 0x21d   :  { %v291_v0 = vadd.f32 %v330_v60, %v282_v61 }
 0x21e   :  { %v290_v1 = vadd.f32 %v330_v60, %v281_v63 }
 0x21f   :  { %293 = vst [vmem:[#allocation11 + $0x8] sm:$0xff] %v291_v0 }
 0x220   :  { %292 = vst [vmem:[#allocation11] sm:$0xff] %v290_v1 }
 0x221   :  { %630 = shalt.err (!%p627_p2)
}
 0x222   :  { %s631_s21 = scalar_lea.hbm %s820_s7, 256 }
 0x223   :  { %p632_p3 = scmp.ne.s32.totalorder %s820_s7, %s631_s21  ;;  %p635_p4 = scmp.lt.u32.totalorder %s631_s21, %s820_s7 }
 0x225   :  { %p637_p5 = pnand %p635_p4, %p632_p3 }
 0x227   :  { %640 = shalt.err (!%p637_p5)
}
 0x228   :  { %317 = dma.vmem_to_hbm [thread:$0]  %s312_s19, 256, %s820_s7, [#allocation12], %s653_s13, %s653_s13, %s654_s14  }
 0x229   :  { %647 = dma.done.wait [#allocation4], 256  }
 0x22a   :  { %648 = vsyncadd [#allocation4], 4294967040 }
 0x22b   :  { %649 = dma.done.wait [#allocation12], 256  }
 0x22c   :  { %650 = vsyncadd [#allocation12], 4294967040 }
 0x22d   :  { %324 = vsyncpa [#allocation3], 1 }
 0x22e   :  { %325 = vsyncpa [#allocation6], 1 }
 0x22f   :  { %326 = vsyncpa [#allocation9], 1 }
 0x230   :  { %327 = vsyncpa [#allocation4], 1 }
 0x231   :  { %328 = vsyncpa [#allocation12], 1 }

// kernel: tpu_custom_call.1
= control target key start
LH: loop header
LB: loop body
LE: loop exit
PB: predicated region body
PF: predicated region fallthrough
CT: control target
= control target key end

     0   :  { %13 = vsyncpa [#allocation3], 0  ;;  %s813_s0 = inlined_call_operand.hbm [shape: f32[16,128], index: 0, kind: input, shape index: {}]   ;;  %s814_s1 = inlined_call_operand.hbm [shape: f32[16,128], index: 1, kind: input, shape index: {}]   ;;  %s815_s2 = inlined_call_operand.hbm [shape: f32[128,128], index: 2, kind: input, shape index: {}]   ;;  %s816_s3 = inlined_call_operand.vmem [shape: f32[1,128], index: 3, kind: input, shape index: {}]   ;;  %s817_s4 = inlined_call_operand.hbm [shape: f32[128,128], index: 4, kind: input, shape index: {}]   ;;  %s818_s5 = inlined_call_operand.vmem [shape: f32[1,128], index: 5, kind: input, shape index: {}]   ;;  %s819_s6 = inlined_call_operand.hbm [shape: f32[16,128], index: 6, kind: output, shape index: {0}]   ;;  %s820_s7 = inlined_call_operand.hbm [shape: f32[16,128], index: 7, kind: output, shape index: {1}]  }
   0x1   :  { %14 = vsyncpa [#allocation6], 0 }
   0x2   :  { %15 = vsyncpa [#allocation9], 0 }
   0x3   :  { %16 = vsyncpa [#allocation4], 0 }
   0x4   :  { %17 = vsyncpa [#allocation12], 0  ;;  %s651_s24 = smov [#allocation5]   ;;  %s652_s26 = smov [#allocation2]  }
   0x5   :  { %s35_s25 = sshll.u32 %s651_s24, 4  ;;  %s23_s27 = sshll.u32 %s652_s26, 4  ;;  %s36_s25 = int_to_ptr.vmem [resolvable:$true] %s35_s25  ;;  %s699_s27 = int_to_ptr.vmem [resolvable:$true] %s23_s27 }
   0x6   :  { %s509_s30 = scalar_lea.hbm %s814_s1, 256 }
   0x7   :  { %p510_p0 = scmp.ne.s32.totalorder %s814_s1, %s509_s30  ;;  %p513_p1 = scmp.lt.u32.totalorder %s509_s30, %s814_s1 }
   0x9   :  { %p515_p2 = pnand %p513_p1, %p510_p0 }
   0xb   :  { %518 = shalt.err (!%p515_p2)
}
   0xc   :  { %s519_s12 = scalar_lea.vmem %s36_s25, 256  ;;  %p524_p4 = scmp.lt.s32.totalorder %s36_s25, %s36_s25 }
   0xd   :  { %p520_p3 = scmp.ne.s32.totalorder %s36_s25, %s519_s12  ;;  %p525_p5 = scmp.lt.s32.totalorder %s519_s12, %s519_s12 }
   0xf   :  { %p526_p6 = por %p525_p5, %p524_p4 }
  0x11   :  { %p527_p7 = pnand %p526_p6, %p520_p3 }
  0x13   :  { %530 = shalt.err (!%p527_p7)
}
  0x14   :  { %s653_s13 = smov 128   ;;  %s654_s14 = smov 8  }
  0x15   :  { %41 = dma.hbm_to_vmem [thread:$0]  %s814_s1, 256, %s36_s25, [#allocation6], %s653_s13, %s653_s13, %s654_s14  }
  0x16   :  { %s531_s19 = scalar_lea.hbm %s813_s0, 256 }
  0x17   :  { %p532_p8 = scmp.ne.s32.totalorder %s813_s0, %s531_s19  ;;  %p535_p9 = scmp.lt.u32.totalorder %s531_s19, %s813_s0 }
  0x19   :  { %p537_p10 = pnand %p535_p9, %p532_p8 }
  0x1b   :  { %540 = shalt.err (!%p537_p10)
}
  0x1c   :  { %s541_s24 = scalar_lea.vmem %s699_s27, 256  ;;  %p546_p12 = scmp.lt.s32.totalorder %s699_s27, %s699_s27 }
  0x1d   :  { %p542_p11 = scmp.ne.s32.totalorder %s699_s27, %s541_s24  ;;  %p547_p13 = scmp.lt.s32.totalorder %s541_s24, %s541_s24 }
  0x1f   :  { %p548_p0 = por %p547_p13, %p546_p12 }
  0x21   :  { %p549_p1 = pnand %p548_p0, %p542_p11 }
  0x23   :  { %552 = shalt.err (!%p549_p1)
}
  0x24   :  { %29 = dma.hbm_to_vmem [thread:$0]  %s813_s0, 256, %s699_s27, [#allocation3], %s653_s13, %s653_s13, %s654_s14  }
  0x25   :  { %s655_s26 = smov [#allocation7]   ;;  %s656_s29 = smov [#allocation8]  }
  0x26   :  { %s47_s28 = sshll.u32 %s655_s26, 4  ;;  %s61_s30 = sshll.u32 %s656_s29, 4  ;;  %s48_s28 = int_to_ptr.vmem [resolvable:$true] %s47_s28  ;;  %s736_s30 = int_to_ptr.vmem [resolvable:$true] %s61_s30 }
  0x27   :  { %s553_s10 = scalar_lea.hbm %s815_s2, 2048 }
  0x28   :  { %p554_p2 = scmp.ne.s32.totalorder %s815_s2, %s553_s10  ;;  %p557_p3 = scmp.lt.u32.totalorder %s553_s10, %s815_s2 }
  0x2a   :  { %p559_p4 = pnand %p557_p3, %p554_p2 }
  0x2c   :  { %562 = shalt.err (!%p559_p4)
}
  0x2d   :  { %s563_s0 = scalar_lea.vmem %s48_s28, 2048  ;;  %p568_p6 = scmp.lt.s32.totalorder %s48_s28, %s48_s28 }
  0x2e   :  { %p564_p5 = scmp.ne.s32.totalorder %s48_s28, %s563_s0  ;;  %p569_p7 = scmp.lt.s32.totalorder %s563_s0, %s563_s0 }
  0x30   :  { %p570_p8 = por %p569_p7, %p568_p6 }
  0x32   :  { %p571_p9 = pnand %p570_p8, %p564_p5 }
  0x34   :  { %574 = shalt.err (!%p571_p9)
}
  0x35   :  { %53 = dma.hbm_to_vmem [thread:$0]  %s815_s2, 2048, %s48_s28, [#allocation6], %s653_s13, %s653_s13, %s654_s14  }
  0x36   :  { %s575_s20 = scalar_lea.hbm %s817_s4, 2048 }
  0x37   :  { %p576_p10 = scmp.ne.s32.totalorder %s817_s4, %s575_s20  ;;  %p579_p11 = scmp.lt.u32.totalorder %s575_s20, %s817_s4 }
  0x39   :  { %p581_p12 = pnand %p579_p11, %p576_p10 }
  0x3b   :  { %584 = shalt.err (!%p581_p12)
}
  0x3c   :  { %s585_s1 = scalar_lea.vmem %s736_s30, 2048  ;;  %p590_p0 = scmp.lt.s32.totalorder %s736_s30, %s736_s30 }
  0x3d   :  { %p586_p13 = scmp.ne.s32.totalorder %s736_s30, %s585_s1  ;;  %p591_p1 = scmp.lt.s32.totalorder %s585_s1, %s585_s1 }
  0x3f   :  { %p592_p2 = por %p591_p1, %p590_p0 }
  0x41   :  { %p593_p3 = pnand %p592_p2, %p586_p13 }
  0x43   :  { %596 = shalt.err (!%p593_p3)
}
  0x44   :  { %67 = dma.hbm_to_vmem [thread:$0]  %s817_s4, 2048, %s736_s30, [#allocation9], %s653_s13, %s653_s13, %s654_s14  }
  0x45   :  { %641 = dma.done.wait [#allocation3], 256  }
  0x46   :  { %642 = vsyncadd [#allocation3], 4294967040 }
  0x47   :  { %643 = dma.done.wait [#allocation6], 2304  }
  0x48   :  { %644 = vsyncadd [#allocation6], 4294964992 }
  0x49   :  { %645 = dma.done.wait [#allocation9], 2048  }
  0x4a   :  { %646 = vsyncadd [#allocation9], 4294965248  ;;  %v86_v0 = vld [vmem:[#allocation7] sm:$0xff]  ;;  %v87_v1 = vld [vmem:[#allocation7 + $0x8] sm:$0xff]  ;;  %s657_s28 = smov [#allocation10]  }
  0x4b   :  { %v88_v2 = vld [vmem:[#allocation7 + $0x10] sm:$0xff]  ;;  %v437_v3 = vpack.c.bf16 %v87_v1, %v86_v0  ;;  %v89_v4 = vld [vmem:[#allocation7 + $0x18] sm:$0xff]  ;;  %v90_v6 = vld [vmem:[#allocation7 + $0x20] sm:$0xff]  ;;  %s299_s29 = sshll.u32 %s657_s28, 4  ;;  %s300_s29 = int_to_ptr.vmem [resolvable:$true] %s299_s29 }
  0x4c   :  { %v441_v5 = vpack.c.bf16 %v89_v4, %v88_v2  ;;  %v91_v7 = vld [vmem:[#allocation7 + $0x28] sm:$0xff]  ;;  %v92_v9 = vld [vmem:[#allocation7 + $0x30] sm:$0xff]  ;;  %v93_v10 = vld [vmem:[#allocation7 + $0x38] sm:$0xff]  ;;  %s597_s30 = scalar_lea.vmem %s300_s29, 256  ;;  %p602_p5 = scmp.lt.s32.totalorder %s300_s29, %s300_s29 }
  0x4d   :  { %438 = vmatprep.subr.bf16.mxu0 %v437_v3  ;;  %v445_v8 = vpack.c.bf16 %v91_v7, %v90_v6  ;;  %v773_v11 = vld [vmem:[#allocation5] sm:$0xff]  ;;  %v190_v12 = vld [vmem:[#allocation8] sm:$0xff]  ;;  %v191_v13 = vld [vmem:[#allocation8 + $0x8] sm:$0xff]  ;;  %v449_v20 = vpack.c.bf16 %v93_v10, %v92_v9  ;;  %p598_p4 = scmp.ne.s32.totalorder %s300_s29, %s597_s30  ;;  %p603_p6 = scmp.lt.s32.totalorder %s597_s30, %s597_s30 }
  0x4e   :  { %440 = vmatpush3.bf16.msra.mxu0 %v437_v3  ;;  %399 = vmatprep.mubr.f32.mxu0 %v773_v11  ;;  %v192_v14 = vld [vmem:[#allocation8 + $0x10] sm:$0xff]  ;;  %v469_v15 = vpack.c.bf16 %v191_v13, %v190_v12  ;;  %v193_v16 = vld [vmem:[#allocation8 + $0x18] sm:$0xff]  ;;  %v194_v18 = vld [vmem:[#allocation8 + $0x20] sm:$0xff] }
  0x4f   :  { %442 = vmatprep.subr.bf16.mxu0 %v441_v5  ;;  %v473_v17 = vpack.c.bf16 %v193_v16, %v192_v14  ;;  %v195_v19 = vld [vmem:[#allocation8 + $0x28] sm:$0xff]  ;;  %v94_v21 = vld [vmem:[#allocation7 + $0x40] sm:$0xff]  ;;  %v196_v24 = vld [vmem:[#allocation8 + $0x30] sm:$0xff]  ;;  %p604_p7 = por %p603_p6, %p602_p5 }
  0x50   :  { %470 = vmatprep.subr.bf16.mxu1 %v469_v15  ;;  %v95_v22 = vld [vmem:[#allocation7 + $0x48] sm:$0xff]  ;;  %v477_v23 = vpack.c.bf16 %v195_v19, %v194_v18  ;;  %v197_v25 = vld [vmem:[#allocation8 + $0x38] sm:$0xff]  ;;  %v96_v27 = vld [vmem:[#allocation7 + $0x50] sm:$0xff] }
  0x51   :  { %472 = vmatpush3.bf16.msra.mxu1 %v469_v15  ;;  %v453_v26 = vpack.c.bf16 %v95_v22, %v94_v21  ;;  %v97_v28 = vld [vmem:[#allocation7 + $0x58] sm:$0xff]  ;;  %v481_v29 = vpack.c.bf16 %v197_v25, %v196_v24  ;;  %v198_v30 = vld [vmem:[#allocation8 + $0x40] sm:$0xff]  ;;  %v199_v31 = vld [vmem:[#allocation8 + $0x48] sm:$0xff]  ;;  %p605_p8 = pnand %p604_p7, %p598_p4 }
  0x52   :  { %444 = vmatpush3.bf16.msra.mxu0 %v441_v5  ;;  %474 = vmatprep.subr.bf16.mxu1 %v473_v17  ;;  %v457_v32 = vpack.c.bf16 %v97_v28, %v96_v27  ;;  %v98_v33 = vld [vmem:[#allocation7 + $0x60] sm:$0xff]  ;;  %v99_v34 = vld [vmem:[#allocation7 + $0x68] sm:$0xff]  ;;  %v485_v35 = vpack.c.bf16 %v199_v31, %v198_v30  ;;  %v200_v36 = vld [vmem:[#allocation8 + $0x50] sm:$0xff] }
  0x53   :  { %446 = vmatprep.subr.bf16.mxu0 %v445_v8  ;;  %v201_v37 = vld [vmem:[#allocation8 + $0x58] sm:$0xff]  ;;  %v461_v38 = vpack.c.bf16 %v99_v34, %v98_v33  ;;  %v100_v39 = vld [vmem:[#allocation7 + $0x70] sm:$0xff]  ;;  %v202_v42 = vld [vmem:[#allocation8 + $0x60] sm:$0xff] }
  0x54   :  { %v101_v40 = vld [vmem:[#allocation7 + $0x78] sm:$0xff]  ;;  %v489_v41 = vpack.c.bf16 %v201_v37, %v200_v36  ;;  %v203_v43 = vld [vmem:[#allocation8 + $0x68] sm:$0xff]  ;;  %v204_v47 = vld [vmem:[#allocation8 + $0x70] sm:$0xff] }
  0x55   :  { %476 = vmatpush3.bf16.msra.mxu1 %v473_v17  ;;  %v465_v44 = vpack.c.bf16 %v101_v40, %v100_v39  ;;  %v493_v45 = vpack.c.bf16 %v203_v43, %v202_v42  ;;  %v85_v46 = vld [vmem:[#allocation5 + $0x8] sm:$0xff]  ;;  %v83_v50 = vld [vmem:[#allocation2 + $0x8] sm:$0xff]  ;;  %v82_v51 = vld [vmem:[#allocation2] sm:$0xff] }
  0x56   :  { %448 = vmatpush3.bf16.msra.mxu0 %v445_v8  ;;  %478 = vmatprep.subr.bf16.mxu1 %v477_v23  ;;  %v205_v48 = vld [vmem:[#allocation8 + $0x78] sm:$0xff]  ;;  %v329_v53 = vld [vmem:[%s816_s3] ss:$0 sm:$0xff] }
  0x57   :  { %450 = vmatprep.subr.bf16.mxu0 %v449_v20  ;;  %v497_v49 = vpack.c.bf16 %v205_v48, %v204_v47 }
  0x59   :  { %480 = vmatpush3.bf16.msra.mxu1 %v477_v23 }
  0x5a   :  { %452 = vmatpush3.bf16.msra.mxu0 %v449_v20  ;;  %482 = vmatprep.subr.bf16.mxu1 %v481_v29 }
  0x5b   :  { %454 = vmatprep.subr.bf16.mxu0 %v453_v26 }
  0x5d   :  { %484 = vmatpush3.bf16.msra.mxu1 %v481_v29 }
  0x5e   :  { %456 = vmatpush3.bf16.msra.mxu0 %v453_v26  ;;  %486 = vmatprep.subr.bf16.mxu1 %v485_v35 }
  0x5f   :  { %458 = vmatprep.subr.bf16.mxu0 %v457_v32 }
  0x61   :  { %488 = vmatpush3.bf16.msra.mxu1 %v485_v35 }
  0x62   :  { %460 = vmatpush3.bf16.msra.mxu0 %v457_v32  ;;  %490 = vmatprep.subr.bf16.mxu1 %v489_v41 }
  0x63   :  { %462 = vmatprep.subr.bf16.mxu0 %v461_v38 }
  0x65   :  { %492 = vmatpush3.bf16.msra.mxu1 %v489_v41 }
  0x66   :  { %464 = vmatpush3.bf16.msra.mxu0 %v461_v38  ;;  %494 = vmatprep.subr.bf16.mxu1 %v493_v45 }
  0x67   :  { %466 = vmatprep.subr.bf16.mxu0 %v465_v44 }
  0x69   :  { %496 = vmatpush3.bf16.msra.mxu1 %v493_v45 }
  0x6a   :  { %468 = vmatpush3.bf16.msra.mxu0 %v465_v44  ;;  %498 = vmatprep.subr.bf16.mxu1 %v497_v49 }
  0x6d   :  { %400 = vmatmul.mubr.f32.vlgmr.msra.gmra.mrb[0].mxu0 %v85_v46  ;;  %500 = vmatpush3.bf16.msra.mxu1 %v497_v49 }
 0x140   :  { %v401_v52 = vpop.f32.mrb[0].mxu0 }
 0x141   :  { %v178_v54 = vadd.f32 %v401_v52, %v83_v50  ;;  %v168_v55 = vpop.f32.mrb[1].mxu0 }
 0x142   :  { %v177_v56 = vadd.f32 %v168_v55, %v82_v51 }
 0x143   :  { %v187_v57 = vadd.f32 %v329_v53, %v178_v54 }
 0x144   :  { %v186_v58 = vadd.f32 %v329_v53, %v177_v56 }
 0x145   :  { %189 = vst [vmem:[#allocation10 + $0x8] sm:$0xff] %v187_v57 }
 0x146   :  { %434 = vmatprep.mubr.f32.mxu1 %v186_v58  ;;  %188 = vst [vmem:[#allocation10] sm:$0xff] %v186_v58 }
 0x147   :  { %435 = vmatmul.mubr.f32.vlgmr.msra.gmra.mrb[0].mxu1 %v187_v57 }
 0x148   :  { %608 = shalt.err (!%p605_p8)
}
 0x149   :  { %s609_s9 = scalar_lea.hbm %s819_s6, 256 }
 0x14a   :  { %p610_p9 = scmp.ne.s32.totalorder %s819_s6, %s609_s9  ;;  %p613_p10 = scmp.lt.u32.totalorder %s609_s9, %s819_s6 }
 0x14c   :  { %p615_p11 = pnand %p613_p10, %p610_p9 }
 0x14e   :  { %618 = shalt.err (!%p615_p11)
}
 0x14f   :  { %305 = dma.vmem_to_hbm [thread:$0]  %s300_s29, 256, %s819_s6, [#allocation4], %s653_s13, %s653_s13, %s654_s14  }
 0x150   :  { %v330_v60 = vld [vmem:[%s818_s5] ss:$0 sm:$0xff]  ;;  %s658_s18 = smov [#allocation11]  }
 0x151   :  { %s311_s19 = sshll.u32 %s658_s18, 4  ;;  %s312_s19 = int_to_ptr.vmem [resolvable:$true] %s311_s19 }
 0x152   :  { %s619_s20 = scalar_lea.vmem %s312_s19, 256  ;;  %p624_p13 = scmp.lt.s32.totalorder %s312_s19, %s312_s19 }
 0x153   :  { %p620_p12 = scmp.ne.s32.totalorder %s312_s19, %s619_s20  ;;  %p625_p0 = scmp.lt.s32.totalorder %s619_s20, %s619_s20 }
 0x155   :  { %p626_p1 = por %p625_p0, %p624_p13 }
 0x157   :  { %p627_p2 = pnand %p626_p1, %p620_p12 }
 0x21a   :  { %v436_v59 = vpop.f32.mrb[0].mxu1 }
 0x21b   :  { %v282_v61 = vadd.f32 %v436_v59, %v85_v46  ;;  %v272_v62 = vpop.f32.mrb[1].mxu1 }
 0x21c   :  { %v281_v63 = vadd.f32 %v272_v62, %v773_v11 }
 0x21d   :  { %v291_v0 = vadd.f32 %v330_v60, %v282_v61 }
 0x21e   :  { %v290_v1 = vadd.f32 %v330_v60, %v281_v63 }
 0x21f   :  { %293 = vst [vmem:[#allocation11 + $0x8] sm:$0xff] %v291_v0 }
 0x220   :  { %292 = vst [vmem:[#allocation11] sm:$0xff] %v290_v1 }
 0x221   :  { %630 = shalt.err (!%p627_p2)
}
 0x222   :  { %s631_s21 = scalar_lea.hbm %s820_s7, 256 }
 0x223   :  { %p632_p3 = scmp.ne.s32.totalorder %s820_s7, %s631_s21  ;;  %p635_p4 = scmp.lt.u32.totalorder %s631_s21, %s820_s7 }
 0x225   :  { %p637_p5 = pnand %p635_p4, %p632_p3 }
 0x227   :  { %640 = shalt.err (!%p637_p5)
}
 0x228   :  { %317 = dma.vmem_to_hbm [thread:$0]  %s312_s19, 256, %s820_s7, [#allocation12], %s653_s13, %s653_s13, %s654_s14  }
 0x229   :  { %647 = dma.done.wait [#allocation4], 256  }
 0x22a   :  { %648 = vsyncadd [#allocation4], 4294967040 }
 0x22b   :  { %649 = dma.done.wait [#allocation12], 256  }
 0x22c   :  { %650 = vsyncadd [#allocation12], 4294967040 }
 0x22d   :  { %324 = vsyncpa [#allocation3], 1 }
 0x22e   :  { %325 = vsyncpa [#allocation6], 1 }
 0x22f   :  { %326 = vsyncpa [#allocation9], 1 }
 0x230   :  { %327 = vsyncpa [#allocation4], 1 }
 0x231   :  { %328 = vsyncpa [#allocation12], 1 }

</bundles_post_ra>
